<compile_context>
chip_gen: v5e
topology: v5e:2x2
jax: 0.10.0
libtpu: 0.0.40
codegen_flags: <defaults>
</compile_context>

<pallas_src>
import functools

import jax
import jax.numpy as jnp
import numpy as np
from jax.experimental import pallas as pl
from jax.experimental.pallas import tpu as pltpu

NEG_SLOPE = 0.01  # torch.nn.functional.leaky_relu default negative_slope


def _round_up(x, m):
    return ((x + m - 1) // m) * m


def _pool_scatter_kernel(idx_ref, vals_ref, col_sum_ref, row_sum_ref, vsum_ref,
                         *, ncols_pad, nrows_pad, nnz):
    """Accumulate per-column / per-row sums (and the total sum) of the values.

    col_sum[c] = sum_k [col_k == c] * vals[k]   (scatter-add as MXU matmul)
    The one-hot is built pre-transposed ([C, T]) so the contraction is a
    standard matmul over the tile axis.  Ragged last-tile rows are masked to
    zero, so they never contribute.
    """
    @pl.when(pl.program_id(0) == 0)
    def _():
        col_sum_ref[...] = jnp.zeros_like(col_sum_ref)
        row_sum_ref[...] = jnp.zeros_like(row_sum_ref)
        vsum_ref[...] = jnp.zeros_like(vsum_ref)

    tile = vals_ref.shape[0]
    base = pl.program_id(0) * tile
    gidx = base + jax.lax.broadcasted_iota(jnp.int32, (tile, 1), 0)   # [T, 1]
    vals = jnp.where(gidx < nnz, vals_ref[...], 0.0)                  # [T, D]

    row = idx_ref[0:1, :]                                             # [1, T]
    col = idx_ref[1:2, :]                                             # [1, T]

    c_iota = jax.lax.broadcasted_iota(jnp.int32, (ncols_pad, tile), 0)
    oh_col = (col == c_iota).astype(jnp.float32)                      # [C, T]
    r_iota = jax.lax.broadcasted_iota(jnp.int32, (nrows_pad, tile), 0)
    oh_row = (row == r_iota).astype(jnp.float32)                      # [R, T]

    col_sum_ref[...] += jnp.dot(oh_col, vals,
                                preferred_element_type=jnp.float32)   # [C, D]
    row_sum_ref[...] += jnp.dot(oh_row, vals,
                                preferred_element_type=jnp.float32)   # [R, D]
    vsum_ref[...] += jnp.sum(vals, axis=0, keepdims=True)             # [1, D]


def _gather_linear_kernel(row_ref, col_ref, vals_ref, cw1_ref, rw2_ref,
                          w0_ref, b_ref, out_ref, *, ncols_pad, nrows_pad):
    """out = leaky_relu(vals @ W0 + cw1[col] + rw2[row] + b_eff).

    cw1 = col_sum @ W1, rw2 = row_sum @ W2 and the mean term are pre-folded
    outside the kernel, so only one small weight matmul plus two one-hot
    gather matmuls remain per tile.  Out-of-range rows of the ragged last
    tile are simply not written back by the pipeline.
    """
    vals = vals_ref[...]                                              # [T, D]
    tile = vals.shape[0]

    c_iota = jax.lax.broadcasted_iota(jnp.int32, (tile, ncols_pad), 1)
    oh_col = (col_ref[...] == c_iota).astype(jnp.float32)             # [T, C]
    r_iota = jax.lax.broadcasted_iota(jnp.int32, (tile, nrows_pad), 1)
    oh_row = (row_ref[...] == r_iota).astype(jnp.float32)             # [T, R]

    out = jnp.dot(vals, w0_ref[...], preferred_element_type=jnp.float32)
    out = out + jnp.dot(oh_col, cw1_ref[...], preferred_element_type=jnp.float32)
    out = out + jnp.dot(oh_row, rw2_ref[...], preferred_element_type=jnp.float32)
    out = out + b_ref[...]                                            # bias + mean term

    out_ref[...] = jnp.where(out >= 0.0, out, NEG_SLOPE * out)


def exchangable_forward(indices, values, w_t, b, nrows, ncols, *, tile_n=2048):
    """indices: [2, nnz] int32 (row, col), values: [nnz, in_dim] f32,
    w_t: [4*in_dim, out_dim] (transposed nn.Linear weight), b: [out_dim],
    (nrows, ncols): dense shape of the sparse matrix.
    Returns new sparse values [nnz, out_dim] (same indices as the input)."""
    nnz, in_dim = values.shape
    D = in_dim
    out_dim = w_t.shape[1]
    if nnz == 0:
        return jnp.zeros((0, out_dim), jnp.float32)

    ncols_pad = _round_up(max(ncols, 1), 128)
    nrows_pad = _round_up(max(nrows, 1), 128)

    # Cap tile_n so the in-kernel one-hot block (tile_n * pad * 4B) stays
    # comfortably inside the default scoped-VMEM budget on every generation.
    onehot_budget = (4 * 1024 * 1024) // (max(ncols_pad, nrows_pad) * 4)
    max_tile = max(128, (onehot_budget // 128) * 128)
    tile_n = max(128, min(tile_n, max_tile, _round_up(nnz, 128)))
    num_tiles = (nnz + tile_n - 1) // tile_n

    vals_f = values.astype(jnp.float32)                     # [nnz, D]
    idx = indices.astype(jnp.int32)                         # [2, nnz] (kernel 1)
    row_t = idx[0][:, None]                                 # [nnz, 1] (kernel 2)
    col_t = idx[1][:, None]                                 # [nnz, 1] (kernel 2)

    w_t = w_t.astype(jnp.float32)
    w0 = w_t[0 * D:1 * D]        # multiplies values
    w1 = w_t[1 * D:2 * D]        # multiplies col_sum[col]  (Pool(0) / self.row)
    w2 = w_t[2 * D:3 * D]        # multiplies row_sum[row]  (Pool(1) / self.col)
    w3 = w_t[3 * D:4 * D]        # multiplies the mean ("both") term

    # ---- kernel 1: scatter-add per-column / per-row sums + total sum ------
    scatter = functools.partial(_pool_scatter_kernel, ncols_pad=ncols_pad,
                                nrows_pad=nrows_pad, nnz=nnz)
    col_sum, row_sum, vsum = pl.pallas_call(
        scatter,
        out_shape=(jax.ShapeDtypeStruct((ncols_pad, D), jnp.float32),
                   jax.ShapeDtypeStruct((nrows_pad, D), jnp.float32),
                   jax.ShapeDtypeStruct((1, D), jnp.float32)),
        grid_spec=pltpu.PrefetchScalarGridSpec(
            num_scalar_prefetch=0,
            grid=(num_tiles,),
            in_specs=[pl.BlockSpec((2, tile_n), lambda i: (0, i)),
                      pl.BlockSpec((tile_n, D), lambda i: (i, 0))],
            out_specs=[pl.BlockSpec((ncols_pad, D), lambda i: (0, 0)),
                       pl.BlockSpec((nrows_pad, D), lambda i: (0, 0)),
                       pl.BlockSpec((1, D), lambda i: (0, 0))]),
        compiler_params=pltpu.CompilerParams(
            dimension_semantics=("arbitrary",)),      # resident accumulators
    )(idx, vals_f)

    # Reassociate: push the pooled sums through their weight blocks once
    # (tiny XLA matmuls) and fold the mean term into the bias.
    cw1 = col_sum @ w1                                           # [C, out_dim]
    rw2 = row_sum @ w2                                           # [R, out_dim]
    b_eff = (vsum / float(nnz)) @ w3 + b.astype(jnp.float32)[None, :]

    # ---- kernel 2: one-hot gather + fused linear + leaky_relu -------------
    gather = functools.partial(_gather_linear_kernel, ncols_pad=ncols_pad,
                               nrows_pad=nrows_pad)
    out = pl.pallas_call(
        gather,
        out_shape=jax.ShapeDtypeStruct((nnz, out_dim), jnp.float32),
        grid_spec=pltpu.PrefetchScalarGridSpec(
            num_scalar_prefetch=0,
            grid=(num_tiles,),
            in_specs=[pl.BlockSpec((tile_n, 1), lambda i: (i, 0)),
                      pl.BlockSpec((tile_n, 1), lambda i: (i, 0)),
                      pl.BlockSpec((tile_n, D), lambda i: (i, 0)),
                      pl.BlockSpec((ncols_pad, out_dim), lambda i: (0, 0)),
                      pl.BlockSpec((nrows_pad, out_dim), lambda i: (0, 0)),
                      pl.BlockSpec((D, out_dim), lambda i: (0, 0)),
                      pl.BlockSpec((1, out_dim), lambda i: (0, 0))],
            out_specs=pl.BlockSpec((tile_n, out_dim), lambda i: (i, 0))),
        compiler_params=pltpu.CompilerParams(
            dimension_semantics=("parallel",)),       # megacore-splittable
    )(row_t, col_t, vals_f, cw1, rw2, w0, b_eff)

    return out


if __name__ == "__main__":
    key = jax.random.PRNGKey(0)
    k1, k2, k3, k4 = jax.random.split(key, 4)

    nrows, ncols, in_dim, out_dim = 16, 16, 8, 16

    # Deterministic sparse matrix (COO) with dense value dim in_dim.
    mask = jax.random.uniform(k1, (nrows, ncols)) < 0.3
    rows, cols = jnp.nonzero(mask)
    nnz = int(rows.shape[0])
    values = jax.random.normal(k2, (nnz, in_dim), jnp.float32)
    indices = jnp.stack([rows, cols]).astype(jnp.int32)

    # Deterministic Linear(in_dim*4, out_dim) parameters (weight stored
    # transposed so the layer computes x @ W_t + b).
    w_t = jax.random.normal(k3, (4 * in_dim, out_dim), jnp.float32) * 0.1
    bias = jax.random.normal(k4, (out_dim,), jnp.float32) * 0.1

    out = exchangable_forward(indices, values, w_t, bias, nrows, ncols)
    out = jax.block_until_ready(out)

    # Pure-numpy reference (scatter-add based) to validate semantics.
    v = np.asarray(values)
    r = np.asarray(rows)
    c = np.asarray(cols)
    col_sum_ref = np.zeros((ncols, in_dim), np.float32)
    np.add.at(col_sum_ref, c, v)
    row_sum_ref = np.zeros((nrows, in_dim), np.float32)
    np.add.at(row_sum_ref, r, v)
    both = np.broadcast_to(v.mean(axis=0, keepdims=True), v.shape)
    inputs = np.concatenate([v, col_sum_ref[c], row_sum_ref[r], both], axis=1)
    ref = inputs @ np.asarray(w_t) + np.asarray(bias)[None, :]
    ref = np.where(ref >= 0, ref, NEG_SLOPE * ref)

    np.testing.assert_allclose(np.asarray(out), ref, rtol=1e-4, atol=1e-4)
    print("KERNEL_OK")
</pallas_src>

<mosaic_0001>
module attributes {stable_mosaic.version = 11 : i64} {
  func.func @_pool_scatter_kernel(%arg0: i32, %arg1: memref<2x128xi32, #tpu.memory_space<vmem>>, %arg2: memref<128x8xf32, #tpu.memory_space<vmem>>, %arg3: memref<128x8xf32, #tpu.memory_space<vmem>>, %arg4: memref<128x8xf32, #tpu.memory_space<vmem>>, %arg5: memref<1x8xf32, #tpu.memory_space<vmem>>) attributes {dimension_semantics = [#tpu.dimension_semantics<arbitrary>], iteration_bounds = array<i64: 1>, scalar_prefetch = 0 : i64, scratch_operands = 0 : i64, tpu.core_type = #tpu.core_type<tc>, window_params = [{transform_indices = @transform_0, window_bounds = array<i64: 2, 128>}, {transform_indices = @transform_1, window_bounds = array<i64: 128, 8>}, {pipeline_mode = #tpu.pipeline_mode<synchronous>, transform_indices = @transform_2, window_bounds = array<i64: 128, 8>}, {pipeline_mode = #tpu.pipeline_mode<synchronous>, transform_indices = @transform_3, window_bounds = array<i64: 128, 8>}, {pipeline_mode = #tpu.pipeline_mode<synchronous>, transform_indices = @transform_4, window_bounds = array<i64: 1, 8>}]} {
    %c0_i32 = arith.constant 0 : i32
    %0 = arith.cmpi eq, %arg0, %c0_i32 : i32
    %1 = arith.extui %0 : i1 to i32
    %c0_i32_0 = arith.constant 0 : i32
    %2 = arith.cmpi ne, %1, %c0_i32_0 : i32
    scf.if %2 {
      %cst_20 = arith.constant 0.000000e+00 : f32
      %39 = vector.broadcast %cst_20 : f32 to vector<128x8xf32>
      %c0_21 = arith.constant 0 : index
      %c0_22 = arith.constant 0 : index
      %40 = vector.load %arg3[%c0_21, %c0_22] : memref<128x8xf32, #tpu.memory_space<vmem>>, vector<128x8xf32>
      tpu.vector_store %arg3[%c0_21, %c0_22], %39 {strides = array<i32>} : memref<128x8xf32, #tpu.memory_space<vmem>>, vector<128x8xf32>,
      %cst_23 = arith.constant 0.000000e+00 : f32
      %41 = vector.broadcast %cst_23 : f32 to vector<128x8xf32>
      %c0_24 = arith.constant 0 : index
      %c0_25 = arith.constant 0 : index
      %42 = vector.load %arg4[%c0_24, %c0_25] : memref<128x8xf32, #tpu.memory_space<vmem>>, vector<128x8xf32>
      tpu.vector_store %arg4[%c0_24, %c0_25], %41 {strides = array<i32>} : memref<128x8xf32, #tpu.memory_space<vmem>>, vector<128x8xf32>,
      %cst_26 = arith.constant 0.000000e+00 : f32
      %43 = vector.broadcast %cst_26 : f32 to vector<1x8xf32>
      %c0_27 = arith.constant 0 : index
      %c0_28 = arith.constant 0 : index
      %44 = vector.load %arg5[%c0_27, %c0_28] : memref<1x8xf32, #tpu.memory_space<vmem>>, vector<1x8xf32>
      tpu.vector_store %arg5[%c0_27, %c0_28], %43 {strides = array<i32>} : memref<1x8xf32, #tpu.memory_space<vmem>>, vector<1x8xf32>,
    } else {
    }
    %c128_i32 = arith.constant 128 : i32
    %3 = arith.muli %arg0, %c128_i32 : i32
    %4 = tpu.iota {dimensions = array<i32: 0>} : vector<128x1xi32>
    %5 = vector.broadcast %3 : i32 to vector<128x1xi32>
    %6 = arith.addi %5, %4 : vector<128x1xi32>
    %c87_i32 = arith.constant 87 : i32
    %7 = vector.broadcast %c87_i32 : i32 to vector<128x1xi32>
    %8 = arith.cmpi slt, %6, %7 : vector<128x1xi32>
    %c0 = arith.constant 0 : index
    %c0_1 = arith.constant 0 : index
    %9 = vector.load %arg2[%c0, %c0_1] : memref<128x8xf32, #tpu.memory_space<vmem>>, vector<128x8xf32>
    %cst = arith.constant 0.000000e+00 : f32
    %10 = vector.shape_cast %8 : vector<128x1xi1> to vector<128x1xi1>
    %11 = vector.broadcast %10 : vector<128x1xi1> to vector<128x8xi1>
    %12 = vector.broadcast %cst : f32 to vector<128x8xf32>
    %13 = arith.select %11, %9, %12 : vector<128x8xi1>, vector<128x8xf32>
    %c0_2 = arith.constant 0 : index
    %c0_3 = arith.constant 0 : index
    %14 = vector.load %arg1[%c0_2, %c0_3] : memref<2x128xi32, #tpu.memory_space<vmem>>, vector<1x128xi32>
    %c1 = arith.constant 1 : index
    %c0_4 = arith.constant 0 : index
    %15 = vector.load %arg1[%c1, %c0_4] : memref<2x128xi32, #tpu.memory_space<vmem>>, vector<1x128xi32>
    %16 = tpu.iota {dimensions = array<i32: 0>} : vector<128x128xi32>
    %17 = vector.broadcast %15 : vector<1x128xi32> to vector<128x128xi32>
    %18 = arith.cmpi eq, %17, %16 : vector<128x128xi32>
    %19 = arith.extui %18 : vector<128x128xi1> to vector<128x128xi32>
    %20 = arith.sitofp %19 : vector<128x128xi32> to vector<128x128xf32>
    %21 = tpu.iota {dimensions = array<i32: 0>} : vector<128x128xi32>
    %22 = vector.broadcast %14 : vector<1x128xi32> to vector<128x128xi32>
    %23 = arith.cmpi eq, %22, %21 : vector<128x128xi32>
    %24 = arith.extui %23 : vector<128x128xi1> to vector<128x128xi32>
    %25 = arith.sitofp %24 : vector<128x128xi32> to vector<128x128xf32>
    %c0_5 = arith.constant 0 : index
    %c0_6 = arith.constant 0 : index
    %26 = vector.load %arg3[%c0_5, %c0_6] : memref<128x8xf32, #tpu.memory_space<vmem>>, vector<128x8xf32>
    %cst_7 = arith.constant dense<0.000000e+00> : vector<128x8xf32>
    %27 = tpu.matmul %20, %13, %cst_7 {dimension_numbers = #tpu.dot_dimension_numbers<[1], [0], [0], [1], [0, 0, 1, 1], [], []>} : vector<128x128xf32>, vector<128x8xf32>, vector<128x8xf32> -> vector<128x8xf32>
    %28 = arith.addf %26, %27 : vector<128x8xf32>
    %c0_8 = arith.constant 0 : index
    %c0_9 = arith.constant 0 : index
    %29 = vector.load %arg3[%c0_8, %c0_9] : memref<128x8xf32, #tpu.memory_space<vmem>>, vector<128x8xf32>
    tpu.vector_store %arg3[%c0_8, %c0_9], %28 {strides = array<i32>} : memref<128x8xf32, #tpu.memory_space<vmem>>, vector<128x8xf32>,
    %c0_10 = arith.constant 0 : index
    %c0_11 = arith.constant 0 : index
    %30 = vector.load %arg4[%c0_10, %c0_11] : memref<128x8xf32, #tpu.memory_space<vmem>>, vector<128x8xf32>
    %cst_12 = arith.constant dense<0.000000e+00> : vector<128x8xf32>
    %31 = tpu.matmul %25, %13, %cst_12 {dimension_numbers = #tpu.dot_dimension_numbers<[1], [0], [0], [1], [0, 0, 1, 1], [], []>} : vector<128x128xf32>, vector<128x8xf32>, vector<128x8xf32> -> vector<128x8xf32>
    %32 = arith.addf %30, %31 : vector<128x8xf32>
    %c0_13 = arith.constant 0 : index
    %c0_14 = arith.constant 0 : index
    %33 = vector.load %arg4[%c0_13, %c0_14] : memref<128x8xf32, #tpu.memory_space<vmem>>, vector<128x8xf32>
    tpu.vector_store %arg4[%c0_13, %c0_14], %32 {strides = array<i32>} : memref<128x8xf32, #tpu.memory_space<vmem>>, vector<128x8xf32>,
    %c0_15 = arith.constant 0 : index
    %c0_16 = arith.constant 0 : index
    %34 = vector.load %arg5[%c0_15, %c0_16] : memref<1x8xf32, #tpu.memory_space<vmem>>, vector<1x8xf32>
    %cst_17 = arith.constant dense<0.000000e+00> : vector<8xf32>
    %35 = vector.multi_reduction <add>, %13, %cst_17 [0] : vector<128x8xf32> to vector<8xf32>
    %36 = vector.shape_cast %35 : vector<8xf32> to vector<1x8xf32>
    %37 = arith.addf %34, %36 : vector<1x8xf32>
    %c0_18 = arith.constant 0 : index
    %c0_19 = arith.constant 0 : index
    %38 = vector.load %arg5[%c0_18, %c0_19] : memref<1x8xf32, #tpu.memory_space<vmem>>, vector<1x8xf32>
    tpu.vector_store %arg5[%c0_18, %c0_19], %37 {strides = array<i32>} : memref<1x8xf32, #tpu.memory_space<vmem>>, vector<1x8xf32>,
    return
  }
  func.func @transform_0(%arg0: i32) -> (i32, i32) {
    %c0_i32 = arith.constant 0 : i32
    %c0_i32_0 = arith.constant 0 : i32
    return %c0_i32, %arg0 : i32, i32
  }
  func.func @transform_1(%arg0: i32) -> (i32, i32) {
    %c0_i32 = arith.constant 0 : i32
    %c0_i32_0 = arith.constant 0 : i32
    return %arg0, %c0_i32 : i32, i32
  }
  func.func @transform_2(%arg0: i32) -> (i32, i32) {
    %c0_i32 = arith.constant 0 : i32
    %c0_i32_0 = arith.constant 0 : i32
    %c0_i32_1 = arith.constant 0 : i32
    return %c0_i32, %c0_i32_0 : i32, i32
  }
  func.func @transform_3(%arg0: i32) -> (i32, i32) {
    %c0_i32 = arith.constant 0 : i32
    %c0_i32_0 = arith.constant 0 : i32
    %c0_i32_1 = arith.constant 0 : i32
    return %c0_i32, %c0_i32_0 : i32, i32
  }
  func.func @transform_4(%arg0: i32) -> (i32, i32) {
    %c0_i32 = arith.constant 0 : i32
    %c0_i32_0 = arith.constant 0 : i32
    %c0_i32_1 = arith.constant 0 : i32
    return %c0_i32, %c0_i32_0 : i32, i32
  }
}

</mosaic_0001>

<bundles_post_ra>
// kernel: tpu_custom_call.1
= control target key start
LH: loop header
LB: loop body
LE: loop exit
PB: predicated region body
PF: predicated region fallthrough
CT: control target
= control target key end

     0   :  { %v55_v0 = vlaneseq  ;;  %vm19_vm0 = vcmask 64512   ;;  %s1288_s0 = inlined_call_operand.vmem [shape: s32[2,87], index: 0, kind: input, shape index: {}]   ;;  %s1289_s1 = inlined_call_operand.vmem [shape: f32[87,8], index: 1, kind: input, shape index: {}]   ;;  %s1290_s2 = inlined_call_operand.vmem [shape: f32[128,8], index: 2, kind: output, shape index: {0}]   ;;  %s1291_s3 = inlined_call_operand.vmem [shape: f32[128,8], index: 3, kind: output, shape index: {1}]   ;;  %s1292_s4 = inlined_call_operand.hbm [shape: f32[1,8], index: 4, kind: output, shape index: {2}]  }
   0x1   :  { %v115_v2 = vld [vmem:[%s1289_s1 + $0x50] sm:$0xff]  ;;  %v721_v4 = vld [vmem:[%s1289_s1 + $0x8] sm:$0xff]  ;;  %v726_v5 = vld [vmem:[%s1289_s1] sm:$0xff] }
   0x2   :  { %v708_v1 = vshrl.u32 %v55_v0, 7  ;;  %v716_v3 = vld [vmem:[%s1289_s1 + $0x10] sm:$0xff]  ;;  %v498_v8 = vsel %vm19_vm0, %v721_v4, 0.0  ;;  %v497_v9 = vsel %vm19_vm0, %v726_v5, 0.0  ;;  %v108_v10 = vld [vmem:[%s1289_s1 + $0x18] sm:$0xff]  ;;  %v744_v12 = vld [vmem:[%s1289_s1 + $0x48] sm:$0xff] }
   0x3   :  { %v500_v7 = vsel %vm19_vm0, %v716_v3, 0.0  ;;  %v499_v11 = vadd.f32 %v498_v8, %v497_v9  ;;  %v502_v13 = vsel %vm19_vm0, %v108_v10, 0.0 }
   0x4   :  { %v729_v6 = vadd.s32 80, %v708_v1 }
   0x6   :  { %vm99_vm1 = vcmp.lt.s32.totalorder %v729_v6, 87 }
   0x7   :  { %10 = vsyncpa [#allocation3], 0  ;;  %v747_v14 = vsel %vm99_vm1, %v115_v2, 0.0  ;;  %627 = vmatpush.msk.msra.mxu2 %vm99_vm1, %v115_v2  ;;  %638 = vmatpush.msk.msra.mxu3 %vm99_vm1, %v115_v2  ;;  %v109_v15 = vld [vmem:[%s1289_s1 + $0x20] sm:$0xff]  ;;  %v501_v16 = vadd.f32 %v500_v7, %v499_v11  ;;  %v110_v19 = vld [vmem:[%s1289_s1 + $0x28] sm:$0xff]  ;;  %v64_v28 = vadd.s32 64, %v708_v1 }
   0x8   :  { %v755_v17 = vld [vmem:[%s1289_s1 + $0x40] sm:$0xff]  ;;  %593 = vmatpush.msk.msra.mxu0 %vm99_vm1, %v115_v2  ;;  %610 = vmatpush.msk.msra.mxu1 %vm99_vm1, %v115_v2  ;;  %v504_v18 = vsel %vm19_vm0, %v109_v15, 0.0  ;;  %v766_v21 = vld [vmem:[%s1289_s1 + $0x38] sm:$0xff]  ;;  %v506_v22 = vsel %vm19_vm0, %v110_v19, 0.0  ;;  %v111_v23 = vld [vmem:[%s1289_s1 + $0x30] sm:$0xff]  ;;  %v680_v31 = vmov 1.0  }
   0x9   :  { %628 = vmatpush.msra.mxu2 %v744_v12  ;;  %639 = vmatpush.msra.mxu3 %v744_v12  ;;  %v503_v20 = vadd.f32 %v502_v13, %v501_v16  ;;  %v508_v25 = vsel %vm19_vm0, %v111_v23, 0.0  ;;  %v789_v29 = vld [vmem:[%s1288_s0 + $0x1] ss:$0 sm:$0xff]  ;;  %v794_v30 = vld [vmem:[%s1288_s0] ss:$0 sm:$0xff]  ;;  %v65_v32 = vadd.s32 72, %v708_v1 }
   0xa   :  { %291 = vmatpush.msra.mxu0 %v744_v12  ;;  %405 = vmatpush.msra.mxu1 %v744_v12  ;;  %vm180_vm2 = vcmp.eq.s32.totalorder %v789_v29, %v64_v28  ;;  %vm229_vm3 = vcmp.eq.s32.totalorder %v794_v30, %v64_v28  ;;  %vm172_vm4 = vcmp.eq.s32.totalorder %v789_v29, %v708_v1  ;;  %v57_v33 = vadd.s32 8, %v708_v1  ;;  %s682_s25 = smov [#allocation2]   ;;  %s548_s29 = sshll.u32 %s1292_s4, 4  ;;  %s549_s29 = int_to_ptr.hbm [resolvable:$true] %s548_s29 }
   0xb   :  { %629 = vmatpush.msra.mxu2 %v755_v17  ;;  %640 = vmatpush.msra.mxu3 %v755_v17  ;;  %v505_v24 = vadd.f32 %v504_v18, %v503_v20  ;;  %vm221_vm5 = vcmp.eq.s32.totalorder %v794_v30, %v708_v1  ;;  %vm181_vm6 = vcmp.eq.s32.totalorder %v789_v29, %v65_v32  ;;  %v58_v34 = vadd.s32 16, %v708_v1  ;;  %s546_s26 = sshll.u32 %s682_s25, 4  ;;  %s547_s26 = int_to_ptr.vmem [resolvable:$true] %s546_s26 }
   0xc   :  { %292 = vmatpush.msra.mxu0 %v755_v17  ;;  %406 = vmatpush.msra.mxu1 %v755_v17  ;;  %vm230_vm7 = vcmp.eq.s32.totalorder %v794_v30, %v65_v32  ;;  %vm173_vm8 = vcmp.eq.s32.totalorder %v789_v29, %v57_v33  ;;  %vm222_vm9 = vcmp.eq.s32.totalorder %v794_v30, %v57_v33  ;;  %v67_v35 = vadd.s32 88, %v708_v1 }
   0xd   :  { %630 = vmatpush.msra.mxu2 %v766_v21  ;;  %641 = vmatpush.msra.mxu3 %v766_v21  ;;  %v507_v26 = vadd.f32 %v506_v22, %v505_v24  ;;  %vm182_vm10 = vcmp.eq.s32.totalorder %v789_v29, %v729_v6  ;;  %vm231_vm11 = vcmp.eq.s32.totalorder %v794_v30, %v729_v6  ;;  %v59_v36 = vadd.s32 24, %v708_v1 }
   0xe   :  { %293 = vmatpush.msra.mxu0 %v766_v21  ;;  %407 = vmatpush.msra.mxu1 %v766_v21  ;;  %vm174_vm12 = vcmp.eq.s32.totalorder %v789_v29, %v58_v34  ;;  %vm223_vm13 = vcmp.eq.s32.totalorder %v794_v30, %v58_v34  ;;  %vm183_vm14 = vcmp.eq.s32.totalorder %v789_v29, %v67_v35  ;;  %v68_v37 = vadd.s32 96, %v708_v1 }
   0xf   :  { %631 = vmatpush.msra.mxu2 %v111_v23  ;;  %642 = vmatpush.msra.mxu3 %v111_v23  ;;  %v783_v27 = vadd.f32 %v508_v25, %v507_v26  ;;  %vm232_vm15 = vcmp.eq.s32.totalorder %v794_v30, %v67_v35  ;;  %vm175_vm1 = vcmp.eq.s32.totalorder %v789_v29, %v59_v36  ;;  %v60_v38 = vadd.s32 32, %v708_v1 }
  0x10   :  { %294 = vmatpush.msra.mxu0 %v111_v23  ;;  %408 = vmatpush.msra.mxu1 %v111_v23  ;;  %v681_v39 = vmov 0.0   ;;  %v69_v40 = vadd.s32 104, %v708_v1  ;;  %v61_v41 = vadd.s32 40, %v708_v1  ;;  %v70_v42 = vadd.s32 112, %v708_v1 }
  0x11   :  { %632 = vmatpush.msra.mxu2 %v110_v19  ;;  %643 = vmatpush.msra.mxu3 %v110_v19  ;;  %20 = vst.msk [vmem:[%s1290_s2] sm:$0xff] %vm19_vm0, %v681_v39  ;;  %v62_v43 = vadd.s32 48, %v708_v1  ;;  %v71_v44 = vadd.s32 120, %v708_v1  ;;  %v63_v45 = vadd.s32 56, %v708_v1  ;;  %v510_v58 = vsel %vm19_vm0, %v766_v21, 0.0 }
  0x12   :  { %295 = vmatpush.msra.mxu0 %v110_v19  ;;  %409 = vmatpush.msra.mxu1 %v110_v19  ;;  %21 = vst.msk [vmem:[%s1290_s2 + $0x8] sm:$0xff] %vm19_vm0, %v681_v39  ;;  %v512_v61 = vsel %vm19_vm0, %v755_v17, 0.0  ;;  %v511_v2 = vadd.f32 %v510_v58, %v783_v27  ;;  %v516_v7 = vsel %vm19_vm0, %v747_v14, 0.0 }
  0x13   :  { %633 = vmatpush.msra.mxu2 %v109_v15  ;;  %644 = vmatpush.msra.mxu3 %v109_v15  ;;  %22 = vst.msk [vmem:[%s1290_s2 + $0x10] sm:$0xff] %vm19_vm0, %v681_v39 }
  0x14   :  { %296 = vmatpush.msra.mxu0 %v109_v15  ;;  %410 = vmatpush.msra.mxu1 %v109_v15  ;;  %23 = vst.msk [vmem:[%s1290_s2 + $0x18] sm:$0xff] %vm19_vm0, %v681_v39  ;;  %v513_v6 = vadd.f32 %v512_v61, %v511_v2 }
  0x15   :  { %634 = vmatpush.msra.mxu2 %v108_v10  ;;  %645 = vmatpush.msra.mxu3 %v108_v10  ;;  %24 = vst.msk [vmem:[%s1290_s2 + $0x20] sm:$0xff] %vm19_vm0, %v681_v39 }
  0x16   :  { %297 = vmatpush.msra.mxu0 %v108_v10  ;;  %411 = vmatpush.msra.mxu1 %v108_v10  ;;  %25 = vst.msk [vmem:[%s1290_s2 + $0x28] sm:$0xff] %vm19_vm0, %v681_v39 }
  0x17   :  { %635 = vmatpush.msra.mxu2 %v716_v3  ;;  %646 = vmatpush.msra.mxu3 %v716_v3  ;;  %26 = vst.msk [vmem:[%s1290_s2 + $0x30] sm:$0xff] %vm19_vm0, %v681_v39 }
  0x18   :  { %298 = vmatpush.msra.mxu0 %v716_v3  ;;  %412 = vmatpush.msra.mxu1 %v716_v3  ;;  %27 = vst.msk [vmem:[%s1290_s2 + $0x38] sm:$0xff] %vm19_vm0, %v681_v39  ;;  %v269_v46 = vld [vmem:[%s1290_s2] sm:$0xff]  ;;  %v514_v3 = vsel %vm19_vm0, %v744_v12, 0.0 }
  0x19   :  { %636 = vmatpush.msra.mxu2 %v721_v4  ;;  %647 = vmatpush.msra.mxu3 %v721_v4  ;;  %28 = vst.msk [vmem:[%s1290_s2 + $0x40] sm:$0xff] %vm19_vm0, %v681_v39  ;;  %v270_v59 = vld [vmem:[%s1290_s2 + $0x8] sm:$0xff]  ;;  %v515_v12 = vadd.f32 %v514_v3, %v513_v6 }
  0x1a   :  { %299 = vmatpush.msra.mxu0 %v721_v4  ;;  %413 = vmatpush.msra.mxu1 %v721_v4  ;;  %29 = vst.msk [vmem:[%s1290_s2 + $0x48] sm:$0xff] %vm19_vm0, %v681_v39  ;;  %v271_v13 = vld [vmem:[%s1290_s2 + $0x10] sm:$0xff] }
  0x1b   :  { %637 = vmatpush.msra.mxu2 %v726_v5  ;;  %648 = vmatpush.msra.mxu3 %v726_v5  ;;  %30 = vst.msk [vmem:[%s1290_s2 + $0x50] sm:$0xff] %vm19_vm0, %v681_v39  ;;  %v517_v14 = vadd.f32 %v516_v7, %v515_v12 }
  0x1c   :  { %602 = vmatmul.msk.f32.vlgmr.msra.gmra.mxu2 %vm180_vm2, %v680_v31  ;;  %619 = vmatmul.msk.f32.vlgmr.msra.gmra.mxu3 %vm229_vm3, %v680_v31  ;;  %vm224_vm2 = vcmp.eq.s32.totalorder %v794_v30, %v59_v36  ;;  %vm184_vm3 = vcmp.eq.s32.totalorder %v789_v29, %v68_v37  ;;  %31 = vst.msk [vmem:[%s1290_s2 + $0x58] sm:$0xff] %vm19_vm0, %v681_v39 }
  0x1d   :  { %300 = vmatpush.msra.mxu0 %v726_v5  ;;  %414 = vmatpush.msra.mxu1 %v726_v5  ;;  %32 = vst.msk [vmem:[%s1290_s2 + $0x60] sm:$0xff] %vm19_vm0, %v681_v39  ;;  %v528_v20 = vrot.slane %v517_v14, 4  ;;  %v274_v58 = vld [vmem:[%s1290_s2 + $0x28] sm:$0xff] }
  0x1e   :  { %594 = vmatmul.msk.f32.vlgmr.msra.gmra.mxu0 %vm172_vm4, %v680_v31  ;;  %611 = vmatmul.msk.f32.vlgmr.msra.gmra.mxu1 %vm221_vm5, %v680_v31  ;;  %vm233_vm4 = vcmp.eq.s32.totalorder %v794_v30, %v68_v37  ;;  %vm176_vm5 = vcmp.eq.s32.totalorder %v789_v29, %v60_v38  ;;  %33 = vst.msk [vmem:[%s1290_s2 + $0x68] sm:$0xff] %vm19_vm0, %v681_v39  ;;  %v275_v6 = vld [vmem:[%s1290_s2 + $0x30] sm:$0xff] }
  0x1f   :  { %34 = vst.msk [vmem:[%s1290_s2 + $0x70] sm:$0xff] %vm19_vm0, %v681_v39  ;;  %v529_v23 = vadd.f32 %v528_v20, %v517_v14 }
  0x20   :  { %35 = vst.msk [vmem:[%s1290_s2 + $0x78] sm:$0xff] %vm19_vm0, %v681_v39  ;;  %v277_v52 = vld [vmem:[%s1290_s2 + $0x40] sm:$0xff] }
  0x21   :  { %36 = vst.msk [vmem:[%s1291_s3] sm:$0xff] %vm19_vm0, %v681_v39  ;;  %v278_v4 = vld [vmem:[%s1290_s2 + $0x48] sm:$0xff]  ;;  %v530_v28 = vrot.slane %v529_v23, 2 }
  0x22   :  { %37 = vst.msk [vmem:[%s1291_s3 + $0x8] sm:$0xff] %vm19_vm0, %v681_v39  ;;  %v279_v21 = vld [vmem:[%s1290_s2 + $0x50] sm:$0xff] }
  0x23   :  { %38 = vst.msk [vmem:[%s1291_s3 + $0x10] sm:$0xff] %vm19_vm0, %v681_v39  ;;  %v280_v37 = vld [vmem:[%s1290_s2 + $0x58] sm:$0xff] }
  0x24   :  { %603 = vmatmul.msk.f32.gmra.mxu2 %vm181_vm6, %v680_v31  ;;  %620 = vmatmul.msk.f32.gmra.mxu3 %vm230_vm7, %v680_v31  ;;  %vm225_vm6 = vcmp.eq.s32.totalorder %v794_v30, %v60_v38  ;;  %vm185_vm7 = vcmp.eq.s32.totalorder %v789_v29, %v69_v40  ;;  %39 = vst.msk [vmem:[%s1291_s3 + $0x18] sm:$0xff] %vm19_vm0, %v681_v39 }
  0x25   :  { %40 = vst.msk [vmem:[%s1291_s3 + $0x20] sm:$0xff] %vm19_vm0, %v681_v39 }
  0x26   :  { %595 = vmatmul.msk.f32.gmra.mxu0 %vm173_vm8, %v680_v31  ;;  %612 = vmatmul.msk.f32.gmra.mxu1 %vm222_vm9, %v680_v31  ;;  %vm234_vm8 = vcmp.eq.s32.totalorder %v794_v30, %v69_v40  ;;  %vm177_vm9 = vcmp.eq.s32.totalorder %v789_v29, %v61_v41  ;;  %41 = vst.msk [vmem:[%s1291_s3 + $0x28] sm:$0xff] %vm19_vm0, %v681_v39  ;;  %v283_v12 = vld [vmem:[%s1290_s2 + $0x70] sm:$0xff] }
  0x27   :  { %42 = vst.msk [vmem:[%s1291_s3 + $0x30] sm:$0xff] %vm19_vm0, %v681_v39 }
  0x28   :  { %43 = vst.msk [vmem:[%s1291_s3 + $0x38] sm:$0xff] %vm19_vm0, %v681_v39  ;;  %v383_v47 = vld [vmem:[%s1291_s3] sm:$0xff] }
  0x29   :  { %44 = vst.msk [vmem:[%s1291_s3 + $0x40] sm:$0xff] %vm19_vm0, %v681_v39  ;;  %v384_v60 = vld [vmem:[%s1291_s3 + $0x8] sm:$0xff] }
  0x2a   :  { %45 = vst.msk [vmem:[%s1291_s3 + $0x48] sm:$0xff] %vm19_vm0, %v681_v39  ;;  %v385_v15 = vld [vmem:[%s1291_s3 + $0x10] sm:$0xff] }
  0x2b   :  { %46 = vst.msk [vmem:[%s1291_s3 + $0x50] sm:$0xff] %vm19_vm0, %v681_v39 }
  0x2c   :  { %604 = vmatmul.msk.f32.gmra.mxu2 %vm182_vm10, %v680_v31  ;;  %621 = vmatmul.msk.f32.gmra.mxu3 %vm231_vm11, %v680_v31  ;;  %vm226_vm10 = vcmp.eq.s32.totalorder %v794_v30, %v61_v41  ;;  %vm186_vm11 = vcmp.eq.s32.totalorder %v789_v29, %v70_v42  ;;  %47 = vst.msk [vmem:[%s1291_s3 + $0x58] sm:$0xff] %vm19_vm0, %v681_v39 }
  0x2d   :  { %48 = vst.msk [vmem:[%s1291_s3 + $0x60] sm:$0xff] %vm19_vm0, %v681_v39 }
  0x2e   :  { %596 = vmatmul.msk.f32.gmra.mxu0 %vm174_vm12, %v680_v31  ;;  %613 = vmatmul.msk.f32.gmra.mxu1 %vm223_vm13, %v680_v31  ;;  %vm235_vm12 = vcmp.eq.s32.totalorder %v794_v30, %v70_v42  ;;  %vm178_vm13 = vcmp.eq.s32.totalorder %v789_v29, %v62_v43  ;;  %49 = vst.msk [vmem:[%s1291_s3 + $0x68] sm:$0xff] %vm19_vm0, %v681_v39  ;;  %v389_v7 = vld [vmem:[%s1291_s3 + $0x30] sm:$0xff] }
  0x2f   :  { %50 = vst.msk [vmem:[%s1291_s3 + $0x70] sm:$0xff] %vm19_vm0, %v681_v39 }
  0x30   :  { %51 = vst.msk [vmem:[%s1291_s3 + $0x78] sm:$0xff] %vm19_vm0, %v681_v39  ;;  %v391_v53 = vld [vmem:[%s1291_s3 + $0x40] sm:$0xff] }
  0x31   :  { %v392_v5 = vld [vmem:[%s1291_s3 + $0x48] sm:$0xff] }
  0x32   :  { %v393_v22 = vld [vmem:[%s1291_s3 + $0x50] sm:$0xff] }
  0x33   :  { %v394_v38 = vld [vmem:[%s1291_s3 + $0x58] sm:$0xff] }
  0x34   :  { %605 = vmatmul.msk.f32.gmra.mxu2 %vm183_vm14, %v680_v31  ;;  %622 = vmatmul.msk.f32.gmra.mxu3 %vm232_vm15, %v680_v31  ;;  %vm227_vm14 = vcmp.eq.s32.totalorder %v794_v30, %v62_v43  ;;  %vm187_vm15 = vcmp.eq.s32.totalorder %v789_v29, %v71_v44 }
  0x36   :  { %597 = vmatmul.msk.f32.gmra.mxu0 %vm175_vm1, %v680_v31  ;;  %614 = vmatmul.msk.f32.gmra.mxu1 %vm224_vm2, %v680_v31  ;;  %vm236_vm1 = vcmp.eq.s32.totalorder %v794_v30, %v71_v44  ;;  %vm179_vm2 = vcmp.eq.s32.totalorder %v789_v29, %v63_v45  ;;  %v272_v29 = vld [vmem:[%s1290_s2 + $0x18] sm:$0xff] }
  0x3c   :  { %606 = vmatmul.msk.f32.gmra.mxu2 %vm184_vm3, %v680_v31  ;;  %623 = vmatmul.msk.f32.gmra.mxu3 %vm233_vm4, %v680_v31  ;;  %vm228_vm3 = vcmp.eq.s32.totalorder %v794_v30, %v63_v45  ;;  %vm52_vm4 = vcmask 57344   ;;  %v386_v30 = vld [vmem:[%s1291_s3 + $0x18] sm:$0xff] }
  0x3d   :  { %53 = vst.msk [vmem:[#allocation2] sm:$0x1] %vm52_vm4, %v681_v39 }
  0x3e   :  { %598 = vmatmul.msk.f32.gmra.mxu0 %vm176_vm5, %v680_v31  ;;  %615 = vmatmul.msk.f32.gmra.mxu1 %vm225_vm6, %v680_v31 }
  0x44   :  { %607 = vmatmul.msk.f32.gmra.mxu2 %vm185_vm7, %v680_v31  ;;  %624 = vmatmul.msk.f32.gmra.mxu3 %vm234_vm8, %v680_v31  ;;  %v496_v42 = vld [vmem:[#allocation2] sm:$0x1] }
  0x46   :  { %599 = vmatmul.msk.f32.gmra.mxu0 %vm177_vm9, %v680_v31  ;;  %616 = vmatmul.msk.f32.gmra.mxu1 %vm226_vm10, %v680_v31 }
  0x4c   :  { %608 = vmatmul.msk.f32.gmra.mxu2 %vm186_vm11, %v680_v31  ;;  %625 = vmatmul.msk.f32.gmra.mxu3 %vm235_vm12, %v680_v31 }
  0x4e   :  { %600 = vmatmul.msk.f32.gmra.mxu0 %vm178_vm13, %v680_v31  ;;  %617 = vmatmul.msk.f32.gmra.mxu1 %vm227_vm14, %v680_v31 }
  0x54   :  { %609 = vmatmul.msk.f32.gmra.mxu2 %vm187_vm15, %v680_v31  ;;  %626 = vmatmul.msk.f32.gmra.mxu3 %vm236_vm1, %v680_v31 }
  0x56   :  { %601 = vmatmul.msk.f32.gmra.mxu0 %vm179_vm2, %v680_v31  ;;  %618 = vmatmul.msk.f32.gmra.mxu1 %vm228_vm3, %v680_v31  ;;  %v531_v31 = vadd.f32 %v530_v28, %v529_v23 }
  0x58   :  { %v532_v36 = vrot.slane %v531_v31, 1 }
  0x5a   :  { %v533_v39 = vadd.f32 %v532_v36, %v531_v31 }
  0x5c   :  { %v534_v45 = vadd.f32 %v533_v39, %v496_v42 }
  0x5e   :  { %536 = vst.msk [vmem:[#allocation2] sm:$0x1] %vm52_vm4, %v534_v45 }
  0x5f   :  { %551 = dma.vmem_to_hbm [thread:$0]  %s547_s26, 16, %s549_s29, [#allocation3]  }
  0x9b   :  { %v302_v48 = vpop.f32.mrf.mxu0  ;;  %v416_v49 = vpop.f32.mrf.mxu1 }
  0x9c   :  { %v350_v50 = vadd.f32 %v302_v48, %v269_v46  ;;  %v464_v51 = vadd.f32 %v416_v49, %v383_v47  ;;  %v273_v46 = vld [vmem:[%s1290_s2 + $0x20] sm:$0xff] }
  0x9d   :  { %v387_v47 = vld [vmem:[%s1291_s3 + $0x20] sm:$0xff] }
  0x9e   :  { %367 = vst.msk [vmem:[%s1290_s2] sm:$0xff] %vm19_vm0, %v350_v50 }
  0x9f   :  { %v326_v54 = vpop.f32.mrf.mxu2  ;;  %480 = vst.msk [vmem:[%s1291_s3] sm:$0xff] %vm19_vm0, %v464_v51  ;;  %v440_v55 = vpop.f32.mrf.mxu3 }
  0xa0   :  { %v358_v56 = vadd.f32 %v326_v54, %v277_v52  ;;  %v472_v57 = vadd.f32 %v440_v55, %v391_v53  ;;  %v281_v52 = vld [vmem:[%s1290_s2 + $0x60] sm:$0xff] }
  0xa1   :  { %v395_v53 = vld [vmem:[%s1291_s3 + $0x60] sm:$0xff] }
  0xa2   :  { %375 = vst.msk [vmem:[%s1290_s2 + $0x40] sm:$0xff] %vm19_vm0, %v358_v56 }
  0xa3   :  { %488 = vst.msk [vmem:[%s1291_s3 + $0x40] sm:$0xff] %vm19_vm0, %v472_v57  ;;  %v305_v62 = vpop.f32.mrf.mxu0  ;;  %v419_v63 = vpop.f32.mrf.mxu1 }
  0xa4   :  { %v351_v0 = vadd.f32 %v305_v62, %v270_v59  ;;  %v465_v1 = vadd.f32 %v419_v63, %v384_v60  ;;  %v388_v59 = vld [vmem:[%s1291_s3 + $0x28] sm:$0xff] }
  0xa6   :  { %368 = vst.msk [vmem:[%s1290_s2 + $0x8] sm:$0xff] %vm19_vm0, %v351_v0  ;;  %v282_v0 = vld [vmem:[%s1290_s2 + $0x68] sm:$0xff] }
  0xa7   :  { %v329_v8 = vpop.f32.mrf.mxu2  ;;  %481 = vst.msk [vmem:[%s1291_s3 + $0x8] sm:$0xff] %vm19_vm0, %v465_v1  ;;  %v443_v9 = vpop.f32.mrf.mxu3  ;;  %v396_v1 = vld [vmem:[%s1291_s3 + $0x68] sm:$0xff] }
  0xa8   :  { %v359_v10 = vadd.f32 %v329_v8, %v278_v4  ;;  %v473_v11 = vadd.f32 %v443_v9, %v392_v5 }
  0xaa   :  { %376 = vst.msk [vmem:[%s1290_s2 + $0x48] sm:$0xff] %vm19_vm0, %v359_v10 }
  0xab   :  { %489 = vst.msk [vmem:[%s1291_s3 + $0x48] sm:$0xff] %vm19_vm0, %v473_v11  ;;  %v308_v16 = vpop.f32.mrf.mxu0  ;;  %v422_v17 = vpop.f32.mrf.mxu1 }
  0xac   :  { %v352_v18 = vadd.f32 %v308_v16, %v271_v13  ;;  %v466_v19 = vadd.f32 %v422_v17, %v385_v15  ;;  %v397_v13 = vld [vmem:[%s1291_s3 + $0x70] sm:$0xff] }
  0xae   :  { %369 = vst.msk [vmem:[%s1290_s2 + $0x10] sm:$0xff] %vm19_vm0, %v352_v18  ;;  %v276_v18 = vld [vmem:[%s1290_s2 + $0x38] sm:$0xff] }
  0xaf   :  { %v332_v24 = vpop.f32.mrf.mxu2  ;;  %482 = vst.msk [vmem:[%s1291_s3 + $0x10] sm:$0xff] %vm19_vm0, %v466_v19  ;;  %v446_v25 = vpop.f32.mrf.mxu3  ;;  %v390_v19 = vld [vmem:[%s1291_s3 + $0x38] sm:$0xff] }
  0xb0   :  { %v360_v26 = vadd.f32 %v332_v24, %v279_v21  ;;  %v474_v27 = vadd.f32 %v446_v25, %v393_v22  ;;  %v284_v24 = vld [vmem:[%s1290_s2 + $0x78] sm:$0xff] }
  0xb1   :  { %v398_v25 = vld [vmem:[%s1291_s3 + $0x78] sm:$0xff] }
  0xb2   :  { %377 = vst.msk [vmem:[%s1290_s2 + $0x50] sm:$0xff] %vm19_vm0, %v360_v26 }
  0xb3   :  { %490 = vst.msk [vmem:[%s1291_s3 + $0x50] sm:$0xff] %vm19_vm0, %v474_v27  ;;  %v311_v32 = vpop.f32.mrf.mxu0  ;;  %v425_v33 = vpop.f32.mrf.mxu1 }
  0xb4   :  { %v353_v34 = vadd.f32 %v311_v32, %v272_v29  ;;  %v467_v35 = vadd.f32 %v425_v33, %v386_v30 }
  0xb6   :  { %370 = vst.msk [vmem:[%s1290_s2 + $0x18] sm:$0xff] %vm19_vm0, %v353_v34 }
  0xb7   :  { %v335_v40 = vpop.f32.mrf.mxu2  ;;  %483 = vst.msk [vmem:[%s1291_s3 + $0x18] sm:$0xff] %vm19_vm0, %v467_v35  ;;  %v449_v41 = vpop.f32.mrf.mxu3 }
  0xb8   :  { %v361_v43 = vadd.f32 %v335_v40, %v280_v37  ;;  %v475_v44 = vadd.f32 %v449_v41, %v394_v38 }
  0xba   :  { %378 = vst.msk [vmem:[%s1290_s2 + $0x58] sm:$0xff] %vm19_vm0, %v361_v43 }
  0xbb   :  { %491 = vst.msk [vmem:[%s1291_s3 + $0x58] sm:$0xff] %vm19_vm0, %v475_v44  ;;  %v314_v48 = vpop.f32.mrf.mxu0  ;;  %v428_v49 = vpop.f32.mrf.mxu1 }
  0xbc   :  { %v354_v50 = vadd.f32 %v314_v48, %v273_v46  ;;  %v468_v51 = vadd.f32 %v428_v49, %v387_v47 }
  0xbe   :  { %371 = vst.msk [vmem:[%s1290_s2 + $0x20] sm:$0xff] %vm19_vm0, %v354_v50 }
  0xbf   :  { %v338_v54 = vpop.f32.mrf.mxu2  ;;  %484 = vst.msk [vmem:[%s1291_s3 + $0x20] sm:$0xff] %vm19_vm0, %v468_v51  ;;  %v452_v55 = vpop.f32.mrf.mxu3 }
  0xc0   :  { %v362_v56 = vadd.f32 %v338_v54, %v281_v52  ;;  %v476_v57 = vadd.f32 %v452_v55, %v395_v53 }
  0xc2   :  { %379 = vst.msk [vmem:[%s1290_s2 + $0x60] sm:$0xff] %vm19_vm0, %v362_v56 }
  0xc3   :  { %492 = vst.msk [vmem:[%s1291_s3 + $0x60] sm:$0xff] %vm19_vm0, %v476_v57  ;;  %v317_v60 = vpop.f32.mrf.mxu0  ;;  %v431_v61 = vpop.f32.mrf.mxu1 }
  0xc4   :  { %v355_v62 = vadd.f32 %v317_v60, %v274_v58  ;;  %v469_v63 = vadd.f32 %v431_v61, %v388_v59 }
  0xc6   :  { %372 = vst.msk [vmem:[%s1290_s2 + $0x28] sm:$0xff] %vm19_vm0, %v355_v62 }
  0xc7   :  { %v341_v2 = vpop.f32.mrf.mxu2  ;;  %485 = vst.msk [vmem:[%s1291_s3 + $0x28] sm:$0xff] %vm19_vm0, %v469_v63  ;;  %v455_v3 = vpop.f32.mrf.mxu3 }
  0xc8   :  { %v363_v4 = vadd.f32 %v341_v2, %v282_v0  ;;  %v477_v5 = vadd.f32 %v455_v3, %v396_v1 }
  0xca   :  { %380 = vst.msk [vmem:[%s1290_s2 + $0x68] sm:$0xff] %vm19_vm0, %v363_v4 }
  0xcb   :  { %493 = vst.msk [vmem:[%s1291_s3 + $0x68] sm:$0xff] %vm19_vm0, %v477_v5  ;;  %v320_v8 = vpop.f32.mrf.mxu0  ;;  %v434_v9 = vpop.f32.mrf.mxu1 }
  0xcc   :  { %v356_v10 = vadd.f32 %v320_v8, %v275_v6  ;;  %v470_v11 = vadd.f32 %v434_v9, %v389_v7 }
  0xce   :  { %373 = vst.msk [vmem:[%s1290_s2 + $0x30] sm:$0xff] %vm19_vm0, %v356_v10 }
  0xcf   :  { %v344_v15 = vpop.f32.mrf.mxu2  ;;  %486 = vst.msk [vmem:[%s1291_s3 + $0x30] sm:$0xff] %vm19_vm0, %v470_v11  ;;  %v458_v14 = vpop.f32.mrf.mxu3 }
  0xd0   :  { %v364_v16 = vadd.f32 %v344_v15, %v283_v12  ;;  %v478_v17 = vadd.f32 %v458_v14, %v397_v13 }
  0xd2   :  { %381 = vst.msk [vmem:[%s1290_s2 + $0x70] sm:$0xff] %vm19_vm0, %v364_v16 }
  0xd3   :  { %494 = vst.msk [vmem:[%s1291_s3 + $0x70] sm:$0xff] %vm19_vm0, %v478_v17  ;;  %v323_v20 = vpop.f32.mrf.mxu0  ;;  %v437_v21 = vpop.f32.mrf.mxu1 }
  0xd4   :  { %v357_v22 = vadd.f32 %v323_v20, %v276_v18  ;;  %v471_v23 = vadd.f32 %v437_v21, %v390_v19 }
  0xd6   :  { %374 = vst.msk [vmem:[%s1290_s2 + $0x38] sm:$0xff] %vm19_vm0, %v357_v22 }
  0xd7   :  { %v347_v26 = vpop.f32.mrf.mxu2  ;;  %487 = vst.msk [vmem:[%s1291_s3 + $0x38] sm:$0xff] %vm19_vm0, %v471_v23  ;;  %v461_v27 = vpop.f32.mrf.mxu3 }
  0xd8   :  { %v365_v28 = vadd.f32 %v347_v26, %v284_v24  ;;  %v479_v29 = vadd.f32 %v461_v27, %v398_v25 }
  0xda   :  { %382 = vst.msk [vmem:[%s1290_s2 + $0x78] sm:$0xff] %vm19_vm0, %v365_v28 }
  0xdb   :  { %495 = vst.msk [vmem:[%s1291_s3 + $0x78] sm:$0xff] %vm19_vm0, %v479_v29 }
  0xdc   :  { %678 = dma.done.wait [#allocation3], 16  }
  0xdd   :  { %679 = vsyncadd [#allocation3], 4294967280 }
  0xde   :  { %560 = vsyncpa [#allocation3], 1 }

</bundles_post_ra>
